<compile_context>
chip_gen: v6e
topology: v6e:2x2x1
jax: 0.10.0
libtpu: 0.0.40
codegen_flags: <defaults>
</compile_context>

<pallas_src>
import math

import numpy as np
import jax
import jax.numpy as jnp
from jax.experimental import pallas as pl
from jax.experimental.pallas import tpu as pltpu

N_FFT = 128   # synthesis frame length
HOP = 64      # hop size; N_FFT == 2*HOP (overlap factor 2) is relied on below


def _round_up(x, m):
    return ((x + m - 1) // m) * m


def _synthesis_bases(n_bins, n_fft=N_FFT, hop=HOP):
    """Deterministic synthesis bases: Hann-windowed inverse DFT (real part)."""
    n = np.arange(n_fft)
    k = np.arange(n_bins)
    ang = 2.0 * np.pi * np.outer(k, n) / n_fft            # (K, N)
    win = 0.5 - 0.5 * np.cos(2.0 * np.pi * n / n_fft)     # Hann window
    scale = float(hop) / float(n_fft)
    cr_t = (np.cos(ang) * win[None, :] * scale).T.astype(np.float32)   # (N, K)
    ci_t = (-np.sin(ang) * win[None, :] * scale).T.astype(np.float32)  # (N, K)
    return cr_t, ci_t


def _stacked_basis(n_bins, rows_half):
    """(HOP, 2*rows_half) stacked basis [C_head | C_tail], f32 (cast later)."""
    cr_t, ci_t = _synthesis_bases(n_bins)
    c_full = np.concatenate([cr_t, ci_t], axis=1)          # (N_FFT, 2K)
    c_pad = np.zeros((N_FFT, rows_half), np.float32)       # pad bins to mult-of-8
    c_pad[:, : 2 * n_bins] = c_full
    # columns 0..rows_half-1 act on the *current* frame (head of its window),
    # columns rows_half..2*rows_half-1 act on the *previous* frame (tail).
    return np.concatenate([c_pad[:HOP], c_pad[HOP:]], axis=1)


def _choose_packing(B, F, rows4, *, target_lanes=2048):
    """Pick frames-per-block (tb), packed lane width and lane grid block."""
    # smallest tb making tb*B a multiple of 128 -> lane-dense, zero output
    # lane padding (this is the "pack frames x B densely" review item).
    step = 128 // math.gcd(B, 128)
    tb = max(step, ((target_lanes // max(B, 1)) // step) * step)
    tb = min(tb, _round_up(F + 1, step))     # never exceed the padded frame range
    lanes = tb * B                           # multiple of 128 by construction
    # lane grid block: largest multiple of 128 dividing `lanes`, capped so one
    # (rows4, l_blk) bf16 input block stays <= ~8 MiB (v7x VMEM headroom).
    cap = min(2048, max(128, ((8 << 20) // (rows4 * 2)) // 128 * 128))
    l_blk, c = 128, 128
    while c <= min(lanes, cap):
        if lanes % c == 0:
            l_blk = c
        c += 128
    return tb, lanes, l_blk


def _insgt_kernel(x_ref, c_ref, o_ref):
    # The whole inverse transform + overlap-add for this tile is ONE MXU op:
    #   (HOP, 4K') @ (4K', l_blk) -> (HOP, l_blk), bf16 operands, f32 accum.
    # Every (ti, li) tile is independent (no carried state), so both grid axes
    # are safe to shard across TensorCores.
    o_ref[...] = jnp.dot(c_ref[...], x_ref[...],
                         preferred_element_type=jnp.float32)


def insgt_sl_forward(X, length):
    """Pallas equivalent of INSGT_SL.forward for 5-D input (S, C, K, F, 2)."""
    # TODO(synk): 6-D (nb_targets) variant not implemented; test spec is 5-D.
    S, C, K, F, two = X.shape
    assert two == 2
    B = S * C
    rows_half = _round_up(2 * K, 8)     # current-frame rows [real(K); imag(K)], padded
    rows4 = 2 * rows_half               # + previous-frame rows (stacked contraction)

    tb, lanes, l_blk = _choose_packing(B, F, rows4)
    n_t = -(-(F + 1) // tb)             # need >= F+1 output blocks (last-tail flush)
    f_blocks = n_t * tb
    n_l = lanes // l_blk

    # ---- glue (bf16 end-to-end): one transpose to frame-major, pads, stack --
    Xb = X.astype(jnp.bfloat16)                           # cast BEFORE the shuffle
    # (S,C,K,F,2) -> (F, ri, K, S, C) -> (F, 2K, B): row = ri*K + k, col = s*C + c
    Xf = jnp.transpose(Xb, (3, 4, 2, 0, 1)).reshape(F, 2 * K, B)
    Xf = jnp.pad(Xf, ((0, f_blocks - F), (0, rows_half - 2 * K), (0, 0)))
    # previous-frame stream (frame -1 := 0). Duplicates the bf16 coefficients
    # once so the kernel needs no carried tail and no sequential grid axis.
    # TODO(synk): could be de-duplicated with an in-kernel lane shift + carried
    # tail, at the cost of making the frame axis sequential again.
    Xprev = jnp.concatenate([jnp.zeros_like(Xf[:1]), Xf[:-1]], axis=0)
    Xstk = jnp.concatenate([Xf, Xprev], axis=1)           # (f_blocks, rows4, B)
    # lane-pack tb frames per block: rows = ti*rows4 + r, lane = i*B + b
    Xstk = (Xstk.reshape(n_t, tb, rows4, B)
                .transpose(0, 2, 1, 3)
                .reshape(n_t * rows4, lanes))

    c2 = jnp.asarray(_stacked_basis(K, rows_half), dtype=jnp.bfloat16)

    y_pk = pl.pallas_call(
        _insgt_kernel,
        out_shape=jax.ShapeDtypeStruct((n_t * HOP, lanes), jnp.float32),
        grid=(n_t, n_l),
        in_specs=[
            # stacked coefficients: (4K', lane block), ~1.5 MiB/step at l_blk=2048
            pl.BlockSpec((rows4, l_blk), lambda ti, li: (ti, li)),
            # stacked synthesis basis; constant index map -> stays VMEM-resident
            pl.BlockSpec((HOP, rows4), lambda ti, li: (0, 0)),
        ],
        # lane-dense, non-overlapping output blocks, each written exactly once
        out_specs=pl.BlockSpec((HOP, l_blk), lambda ti, li: (ti, li)),
        compiler_params=pltpu.CompilerParams(
            # no carry -> both axes race-free; lets v7x shard frames across its
            # two TensorCores even when B (and hence n_l) is tiny.
            dimension_semantics=("parallel", "parallel"),
            # explicit VMEM budget (v7x: 64 MiB physical / 32 MiB scoped default)
            vmem_limit_bytes=32 * 1024 * 1024),
    )(Xstk, c2)

    # ---- unpack: (n_t*HOP, tb*B) -> (B, l_out); then trim/pad to `length` ----
    # (one transpose pass over the output; TODO(synk): emit batch-major from
    # the kernel / fuse into the consumer if this pass ever dominates.)
    l_out = f_blocks * HOP
    y = (y_pk.reshape(n_t, HOP, tb, B)
             .transpose(3, 0, 2, 1)
             .reshape(B, l_out))
    if length <= l_out:
        y = y[:, :length]
    else:
        y = jnp.pad(y, ((0, 0), (0, length - l_out)))
    # torch: y.view(*shape[:-3], -1) -> (S, C*length)
    return y.reshape(S, C * length)


# ----------------------------- reference ------------------------------------

def _bf16_round(a):
    """Round-to-nearest-even to bf16 (same rounding the kernel operands get)."""
    a32 = np.asarray(a, dtype=np.float32)
    return np.asarray(
        jnp.asarray(a32).astype(jnp.bfloat16).astype(jnp.float32)
    ).astype(np.float64)


def _reference(X, length):
    """NumPy reference of the same synthetic inverse transform (f64 accum)."""
    X = np.asarray(X, dtype=np.float32)
    S, C, K, F, _ = X.shape
    B = S * C
    Xb = _bf16_round(X)
    cr_t, ci_t = _synthesis_bases(K)
    Cb = _bf16_round(np.concatenate([cr_t, ci_t], axis=1))        # (N_FFT, 2K)
    Xr = np.moveaxis(Xb[..., 0], -1, 0).reshape(F, B, K)
    Xi = np.moveaxis(Xb[..., 1], -1, 0).reshape(F, B, K)
    l_pad = (F - 1) * HOP + N_FFT
    y = np.zeros((l_pad, B), dtype=np.float64)
    for t in range(F):
        stacked = np.concatenate([Xr[t].T, Xi[t].T], axis=0)      # (2K, B)
        y[t * HOP:t * HOP + N_FFT, :] += Cb @ stacked
    out = np.zeros((length, B), dtype=np.float64)
    m = min(length, l_pad)
    out[:m] = y[:m]
    return out.T.reshape(S, C * length)


if __name__ == "__main__":
    S, C, K, F = 2, 2, 64, 8      # nb_samples, nb_channels, nb_bins, nb_frames
    length = 512
    key = jax.random.PRNGKey(0)
    X = jax.random.normal(key, (S, C, K, F, 2), dtype=jnp.float32)

    y = insgt_sl_forward(X, length)
    y = jax.block_until_ready(y)

    assert y.shape == (S, C * length)
    y_ref = _reference(np.asarray(X), length)
    np.testing.assert_allclose(np.asarray(y), y_ref, rtol=1e-3, atol=1e-3)
    print("KERNEL_OK")
</pallas_src>

<mosaic_0001>
module attributes {stable_mosaic.version = 11 : i64} {
  func.func @_insgt_kernel(%arg0: i32, %arg1: i32, %arg2: memref<256x128xbf16, #tpu.memory_space<vmem>>, %arg3: memref<64x256xbf16, #tpu.memory_space<vmem>>, %arg4: memref<64x128xf32, #tpu.memory_space<vmem>>) attributes {dimension_semantics = [#tpu.dimension_semantics<parallel>, #tpu.dimension_semantics<parallel>], iteration_bounds = array<i64: 1, 1>, scalar_prefetch = 0 : i64, scratch_operands = 0 : i64, tpu.core_type = #tpu.core_type<tc>, window_params = [{transform_indices = @transform_0, window_bounds = array<i64: 256, 128>}, {pipeline_mode = #tpu.pipeline_mode<synchronous>, transform_indices = @transform_1, window_bounds = array<i64: 64, 256>}, {transform_indices = @transform_2, window_bounds = array<i64: 64, 128>}]} {
    %c0 = arith.constant 0 : index
    %c0_0 = arith.constant 0 : index
    %0 = vector.load %arg3[%c0, %c0_0] : memref<64x256xbf16, #tpu.memory_space<vmem>>, vector<64x256xbf16>
    %c0_1 = arith.constant 0 : index
    %c0_2 = arith.constant 0 : index
    %1 = vector.load %arg2[%c0_1, %c0_2] : memref<256x128xbf16, #tpu.memory_space<vmem>>, vector<256x128xbf16>
    %cst = arith.constant dense<0.000000e+00> : vector<64x128xf32>
    %2 = tpu.matmul %0, %1, %cst {dimension_numbers = #tpu.dot_dimension_numbers<[1], [0], [0], [1], [0, 0, 1, 1], [], []>} : vector<64x256xbf16>, vector<256x128xbf16>, vector<64x128xf32> -> vector<64x128xf32>
    %c0_3 = arith.constant 0 : index
    %c0_4 = arith.constant 0 : index
    %3 = vector.load %arg4[%c0_3, %c0_4] : memref<64x128xf32, #tpu.memory_space<vmem>>, vector<64x128xf32>
    tpu.vector_store %arg4[%c0_3, %c0_4], %2 {strides = array<i32>} : memref<64x128xf32, #tpu.memory_space<vmem>>, vector<64x128xf32>,
    return
  }
  func.func @transform_0(%arg0: i32, %arg1: i32) -> (i32, i32) {
    %c0_i32 = arith.constant 0 : i32
    return %arg0, %arg1 : i32, i32
  }
  func.func @transform_1(%arg0: i32, %arg1: i32) -> (i32, i32) {
    %c0_i32 = arith.constant 0 : i32
    %c0_i32_0 = arith.constant 0 : i32
    %c0_i32_1 = arith.constant 0 : i32
    return %c0_i32, %c0_i32_0 : i32, i32
  }
  func.func @transform_2(%arg0: i32, %arg1: i32) -> (i32, i32) {
    %c0_i32 = arith.constant 0 : i32
    return %arg0, %arg1 : i32, i32
  }
}

</mosaic_0001>

<bundles_post_ra>
// kernel: tpu_custom_call.1
= control target key start
LH: loop header
LB: loop body
LE: loop exit
PB: predicated region body
PF: predicated region fallthrough
CT: control target
= control target key end

     0   :  { %7 = vsyncpa [#allocation3], 0  ;;  %s526_s0 = inlined_call_operand.hbm [shape: bf16[256,128], index: 0, kind: input, shape index: {}]   ;;  %s527_s1 = inlined_call_operand.hbm [shape: bf16[64,256], index: 1, kind: input, shape index: {}]   ;;  %s528_s2 = inlined_call_operand.hbm [shape: f32[64,128], index: 2, kind: output, shape index: {}]  }
   0x1   :  { %8 = vsyncpa [#allocation6], 0 }
   0x2   :  { %9 = vsyncpa [#allocation4], 0  ;;  %s489_s9 = smov [#allocation2]  }
   0x3   :  { %s15_s10 = sshll.u32 %s489_s9, 4  ;;  %s16_s10 = int_to_ptr.vmem [resolvable:$true] %s15_s10 }
   0x4   :  { %s431_s11 = scalar_lea.vmem %s16_s10, 2048  ;;  %p436_p1 = scmp.lt.s32.totalorder %s16_s10, %s16_s10 }
   0x5   :  { %p432_p0 = scmp.ne.s32.totalorder %s16_s10, %s431_s11  ;;  %p437_p2 = scmp.lt.s32.totalorder %s431_s11, %s431_s11 }
   0x7   :  { %p438_p3 = por %p437_p2, %p436_p1 }
   0x9   :  { %p439_p4 = pnand %p438_p3, %p432_p0 }
   0xb   :  { %442 = shalt.err (!%p439_p4)
}
   0xc   :  { %s490_s12 = smov 64   ;;  %s491_s13 = smov 4  }
   0xd   :  { %21 = dma.hbm_to_vmem [thread:$0]  %s526_s0, 2048, %s16_s10, [#allocation3], %s490_s12, %s490_s12, %s491_s13  }
   0xe   :  { %s492_s16 = smov [#allocation5]  }
   0xf   :  { %s27_s17 = sshll.u32 %s492_s16, 4  ;;  %s28_s17 = int_to_ptr.vmem [resolvable:$true] %s27_s17 }
  0x10   :  { %s451_s18 = scalar_lea.vmem %s28_s17, 1024  ;;  %p456_p6 = scmp.lt.s32.totalorder %s28_s17, %s28_s17 }
  0x11   :  { %p452_p5 = scmp.ne.s32.totalorder %s28_s17, %s451_s18  ;;  %p457_p7 = scmp.lt.s32.totalorder %s451_s18, %s451_s18 }
  0x13   :  { %p458_p8 = por %p457_p7, %p456_p6 }
  0x15   :  { %p459_p9 = pnand %p458_p8, %p452_p5 }
  0x17   :  { %462 = shalt.err (!%p459_p9)
}
  0x18   :  { %s493_s19 = smov 128   ;;  %s494_s20 = smov 8  }
  0x19   :  { %33 = dma.hbm_to_vmem [thread:$0]  %s527_s1, 1024, %s28_s17, [#allocation6], %s493_s19, %s493_s19, %s494_s20  }
  0x1a   :  { %483 = dma.done.wait [#allocation3], 2048  }
  0x1b   :  { %484 = vsyncadd [#allocation3], 4294965248 }
  0x1c   :  { %485 = dma.done.wait [#allocation6], 1024  }
  0x1d   :  { %486 = vsyncadd [#allocation6], 4294966272  ;;  %v395_v0 = vld [vmem:[#allocation2 + $0x78] sm:$0xff]   ;;  %v397_v2 = vld [vmem:[#allocation2 + $0x70] sm:$0xff]   ;;  %s495_s0 = smov [#allocation7]  }
  0x1e   :  { %v396_v1 = vld [vmem:[#allocation2 + $0x38] sm:$0xff]   ;;  %332 = vmatprep.subr.bf16.mxu0 %v395_v0  ;;  %372 = vmatprep.subr.bf16.mxu1 %v395_v0  ;;  %v398_v3 = vld [vmem:[#allocation2 + $0x30] sm:$0xff]   ;;  %v399_v4 = vld [vmem:[#allocation2 + $0x68] sm:$0xff]   ;;  %s295_s1 = sshll.u32 %s495_s0, 4  ;;  %s296_s1 = int_to_ptr.vmem [resolvable:$true] %s295_s1 }
  0x1f   :  { %333 = vmatpush3.bf16.msra.mxu0 %v396_v1  ;;  %380 = vmatpush3.bf16.msra.mxu1 %v396_v1  ;;  %v400_v5 = vld [vmem:[#allocation2 + $0x28] sm:$0xff]   ;;  %v401_v6 = vld [vmem:[#allocation2 + $0x60] sm:$0xff]   ;;  %v403_v8 = vld [vmem:[#allocation2 + $0x58] sm:$0xff]   ;;  %s463_s23 = scalar_lea.vmem %s296_s1, 1024  ;;  %p468_p11 = scmp.lt.s32.totalorder %s296_s1, %s296_s1 }
  0x20   :  { %334 = vmatprep.subr.bf16.mxu0 %v397_v2  ;;  %373 = vmatprep.subr.bf16.mxu1 %v397_v2  ;;  %v402_v7 = vld [vmem:[#allocation2 + $0x20] sm:$0xff]   ;;  %v404_v9 = vld [vmem:[#allocation2 + $0x18] sm:$0xff]   ;;  %v405_v10 = vld [vmem:[#allocation2 + $0x50] sm:$0xff]   ;;  %p464_p10 = scmp.ne.s32.totalorder %s296_s1, %s463_s23  ;;  %p469_p12 = scmp.lt.s32.totalorder %s463_s23, %s463_s23 }
  0x21   :  { %v413_v11 = vld [vmem:[#allocation5 + $0x4] ss:$8 sps:$4 sm:$0xff]   ;;  %v406_v13 = vld [vmem:[#allocation2 + $0x10] sm:$0xff]   ;;  %v411_v18 = vld [vmem:[#allocation5] ss:$8 sps:$4 sm:$0xff]  }
  0x22   :  { %v416_v12 = vld [vmem:[#allocation5 + $0x24] ss:$8 sps:$4 sm:$0xff]   ;;  %249 = vmatprep.mubr.bf16.mxu0 %v413_v11  ;;  %v414_v19 = vld [vmem:[#allocation5 + $0x20] ss:$8 sps:$4 sm:$0xff]   ;;  %v417_v20 = vld [vmem:[#allocation5 + $0x14] ss:$8 sps:$4 sm:$0xff]   ;;  %p470_p13 = por %p469_p12, %p468_p11 }
  0x23   :  { %335 = vmatpush3.bf16.msra.mxu0 %v398_v3  ;;  %381 = vmatpush3.bf16.msra.mxu1 %v398_v3  ;;  %v407_v14 = vld [vmem:[#allocation2 + $0x48] sm:$0xff]   ;;  %v409_v16 = vld [vmem:[#allocation2 + $0x40] sm:$0xff]   ;;  %v419_v21 = vld [vmem:[#allocation5 + $0x34] ss:$8 sps:$4 sm:$0xff]  }
  0x24   :  { %336 = vmatprep.subr.bf16.mxu0 %v399_v4  ;;  %374 = vmatprep.subr.bf16.mxu1 %v399_v4  ;;  %v408_v15 = vld [vmem:[#allocation2 + $0x8] sm:$0xff]   ;;  %v410_v17 = vld [vmem:[#allocation2] sm:$0xff]   ;;  %v421_v22 = vld [vmem:[#allocation5 + $0x10] ss:$8 sps:$4 sm:$0xff]   ;;  %p471_p0 = pnand %p470_p13, %p464_p10 }
  0x25   :  { %265 = vmatprep.mubr.bf16.mxu1 %v416_v12  ;;  %v422_v23 = vld [vmem:[#allocation5 + $0x30] ss:$8 sps:$4 sm:$0xff]  }
  0x27   :  { %337 = vmatpush3.bf16.msra.mxu0 %v400_v5  ;;  %382 = vmatpush3.bf16.msra.mxu1 %v400_v5 }
  0x28   :  { %338 = vmatprep.subr.bf16.mxu0 %v401_v6  ;;  %375 = vmatprep.subr.bf16.mxu1 %v401_v6 }
  0x2b   :  { %339 = vmatpush3.bf16.msra.mxu0 %v402_v7  ;;  %383 = vmatpush3.bf16.msra.mxu1 %v402_v7 }
  0x2c   :  { %340 = vmatprep.subr.bf16.mxu0 %v403_v8  ;;  %376 = vmatprep.subr.bf16.mxu1 %v403_v8 }
  0x2f   :  { %341 = vmatpush3.bf16.msra.mxu0 %v404_v9  ;;  %384 = vmatpush3.bf16.msra.mxu1 %v404_v9 }
  0x30   :  { %342 = vmatprep.subr.bf16.mxu0 %v405_v10  ;;  %377 = vmatprep.subr.bf16.mxu1 %v405_v10 }
  0x33   :  { %343 = vmatpush3.bf16.msra.mxu0 %v406_v13  ;;  %385 = vmatpush3.bf16.msra.mxu1 %v406_v13 }
  0x34   :  { %344 = vmatprep.subr.bf16.mxu0 %v407_v14  ;;  %378 = vmatprep.subr.bf16.mxu1 %v407_v14 }
  0x37   :  { %345 = vmatpush3.bf16.msra.mxu0 %v408_v15  ;;  %386 = vmatpush3.bf16.msra.mxu1 %v408_v15 }
  0x38   :  { %346 = vmatprep.subr.bf16.mxu0 %v409_v16  ;;  %379 = vmatprep.subr.bf16.mxu1 %v409_v16 }
  0x3b   :  { %347 = vmatpush3.bf16.msra.mxu0 %v410_v17  ;;  %387 = vmatpush3.bf16.msra.mxu1 %v410_v17 }
  0x3e   :  { %250 = vmatmul.mubr.bf16.vlgmr.msra.gmra.mxu0 %v411_v18  ;;  %266 = vmatmul.mubr.bf16.vlgmr.msra.gmra.mxu1 %v414_v19 }
  0x3f   :  { %257 = vmatprep.mubr.bf16.mxu0 %v417_v20  ;;  %273 = vmatprep.mubr.bf16.mxu1 %v419_v21 }
  0x46   :  { %258 = vmatmul.mubr.bf16.gmra.mxu0 %v421_v22  ;;  %274 = vmatmul.mubr.bf16.gmra.mxu1 %v422_v23 }
  0xfe   :  { %v348_v24 = vpop.f32.mrf.mxu0  ;;  %v360_v25 = vpop.f32.mrf.mxu1 }
 0x100   :  { %v349_v26 = vpop.f32.mrf.mxu0  ;;  %v361_v27 = vpop.f32.mrf.mxu1 }
 0x101   :  { %v350_v28 = vadd.f32 %v349_v26, %v348_v24  ;;  %v362_v29 = vadd.f32 %v361_v27, %v360_v25 }
 0x102   :  { %v351_v30 = vpop.f32.mrf.mxu0  ;;  %v363_v31 = vpop.f32.mrf.mxu1 }
 0x103   :  { %282 = vst [vmem:[#allocation7] sm:$0xff] %v350_v28  ;;  %286 = vst [vmem:[#allocation7 + $0x20] sm:$0xff] %v362_v29 }
 0x104   :  { %v352_v32 = vpop.f32.mrf.mxu0  ;;  %v364_v33 = vpop.f32.mrf.mxu1 }
 0x105   :  { %v353_v34 = vadd.f32 %v352_v32, %v351_v30  ;;  %v365_v35 = vadd.f32 %v364_v33, %v363_v31 }
 0x106   :  { %v354_v36 = vpop.f32.mrf.mxu0  ;;  %v366_v37 = vpop.f32.mrf.mxu1 }
 0x107   :  { %283 = vst [vmem:[#allocation7 + $0x8] sm:$0xff] %v353_v34  ;;  %287 = vst [vmem:[#allocation7 + $0x28] sm:$0xff] %v365_v35 }
 0x108   :  { %v355_v38 = vpop.f32.mrf.mxu0  ;;  %v367_v39 = vpop.f32.mrf.mxu1 }
 0x109   :  { %v356_v40 = vadd.f32 %v355_v38, %v354_v36  ;;  %v368_v41 = vadd.f32 %v367_v39, %v366_v37 }
 0x10a   :  { %v357_v42 = vpop.f32.mrf.mxu0  ;;  %v369_v43 = vpop.f32.mrf.mxu1 }
 0x10b   :  { %284 = vst [vmem:[#allocation7 + $0x10] sm:$0xff] %v356_v40  ;;  %288 = vst [vmem:[#allocation7 + $0x30] sm:$0xff] %v368_v41 }
 0x10c   :  { %v358_v44 = vpop.f32.mrf.mxu0  ;;  %v370_v45 = vpop.f32.mrf.mxu1 }
 0x10d   :  { %v359_v46 = vadd.f32 %v358_v44, %v357_v42  ;;  %v371_v47 = vadd.f32 %v370_v45, %v369_v43 }
 0x10f   :  { %285 = vst [vmem:[#allocation7 + $0x18] sm:$0xff] %v359_v46  ;;  %289 = vst [vmem:[#allocation7 + $0x38] sm:$0xff] %v371_v47 }
 0x110   :  { %474 = shalt.err (!%p471_p0)
}
 0x111   :  { %301 = dma.vmem_to_hbm [thread:$0]  %s296_s1, 1024, %s528_s2, [#allocation4], %s493_s19, %s493_s19, %s494_s20  }
 0x112   :  { %487 = dma.done.wait [#allocation4], 1024  }
 0x113   :  { %488 = vsyncadd [#allocation4], 4294966272 }
 0x114   :  { %305 = vsyncpa [#allocation3], 1 }
 0x115   :  { %306 = vsyncpa [#allocation6], 1 }
 0x116   :  { %307 = vsyncpa [#allocation4], 1 }

</bundles_post_ra>
